<compile_context>
chip_gen: v7x
topology: tpu7x:2x2x1
jax: 0.10.0
libtpu: 0.0.40
codegen_flags: <defaults>
</compile_context>

<pallas_src>
import functools

import jax
import jax.numpy as jnp
from jax import lax
from jax.experimental import pallas as pl
from jax.experimental.pallas import tpu as pltpu


def _pick_tile(requested, dim, align):
    """Largest legal block size for `dim`: the full dim, or an align-multiple <= dim."""
    if dim <= max(requested, align):
        return dim  # single block covering the full dim (always a legal block shape)
    return max(align, (min(requested, dim) // align) * align)


def _default_vmem_limit_bytes():
    # Generation-aware scoped-VMEM limit: v7x has 64 MiB physical VMEM per
    # TensorCore (leave compiler headroom); v5e/v6e have 128 MiB.
    try:
        kind = jax.devices()[0].device_kind.lower()
    except Exception:
        kind = ""
    return (48 if "v7" in kind else 64) * 1024 * 1024


def _linear_kernel(d_ref, w_ref, *out_refs):
    # D' = D @ W.T (nn.Linear weight layout [out, in]): contract the LAST axis of
    # both operands so the MXU is fed directly (no in-kernel transpose).
    acc = lax.dot_general(
        d_ref[...], w_ref[...],
        dimension_numbers=(((1,), (1,)), ((), ())),
        preferred_element_type=jnp.float32,
    )
    for o_ref in out_refs:  # f32 D' (returned) [+ bf16 copy for the score kernel]
        o_ref[...] = acc.astype(o_ref.dtype)


def _score_kernel(r_ref, d_ref, o_ref, *, approx_sigmoid):
    # scores = sigmoid(R @ D'.T): cast R to the score dtype in-registers (no extra
    # HBM pass) and contract the last axes of both operands on the MXU.
    x = lax.dot_general(
        r_ref[...].astype(d_ref.dtype), d_ref[...],
        dimension_numbers=(((1,), (1,)), ((), ())),
        preferred_element_type=jnp.float32,
    )
    if approx_sigmoid:
        # exp and approximate reciprocal both sit on the EUP slot; VALU stays free.
        y = pl.reciprocal(1.0 + jnp.exp(-x), approx=True)
    else:
        y = jax.nn.sigmoid(x)
    o_ref[...] = y.astype(o_ref.dtype)


def inner_product_decoder(feature, weight, size_u, size_v, *,
                          tile_m=256, tile_n=512,
                          use_bf16_matmul=True, out_dtype=None,
                          vmem_limit_bytes=None):
    """InnerProductDecoder.forward (eval mode).

    feature: [size_u + size_v, input_dim]; weight: [input_dim, input_dim] in
    nn.Linear layout (y = x @ weight.T). Returns (sigmoid(R @ D'.T), R, D').
    D' is always computed from f32 operands with f32 accumulation (full precision);
    only the score matmul uses bf16 MXU operands when use_bf16_matmul=True.
    """
    assert feature.ndim == 2 and feature.shape[0] == size_u + size_v
    input_dim = feature.shape[1]
    assert weight.shape == (input_dim, input_dim)
    k = input_dim

    out_dtype = feature.dtype if out_dtype is None else out_dtype
    score_dtype = jnp.bfloat16 if use_bf16_matmul else jnp.float32
    if vmem_limit_bytes is None:
        vmem_limit_bytes = _default_vmem_limit_bytes()

    # Dropout is identity in eval mode.
    # TODO(synk): training-mode dropout (p=0.4) would use pltpu.prng_seed +
    # pltpu.stateful_bernoulli inside the kernels.
    r = feature[:size_u]                      # [size_u, K]
    d = feature[size_u:]                      # [size_v, K]

    # Legal, un-padded tiling: row (sublane) tiles aligned to 8, score-column /
    # D'-row (lane) tiles aligned to 128, or equal to the full dim. pl.cdiv grids
    # + Pallas edge-block masking handle ragged size_u / size_v; garbage in
    # partial input blocks only reaches output rows/cols that are masked on store.
    tm = _pick_tile(tile_m, size_u, 8)
    tn = _pick_tile(tile_n, size_v, 128)

    # ---- Kernel A: D' = D @ W.T in f32 (computed once), plus a bf16 copy for B.
    # TODO(synk): for very large input_dim (>~2K on v7x) tile the K axis with a
    # VMEM accumulator instead of keeping the full (K, K) weight block resident.
    a_out_shape = [jax.ShapeDtypeStruct((size_v, k), jnp.float32)]
    a_out_specs = [pl.BlockSpec((tn, k), lambda j: (j, 0))]
    if score_dtype != jnp.float32:
        a_out_shape.append(jax.ShapeDtypeStruct((size_v, k), score_dtype))
        a_out_specs.append(pl.BlockSpec((tn, k), lambda j: (j, 0)))

    a_outs = pl.pallas_call(
        _linear_kernel,
        out_shape=tuple(a_out_shape),
        grid=(pl.cdiv(size_v, tn),),
        in_specs=[
            pl.BlockSpec((tn, k), lambda j: (j, 0)),
            pl.BlockSpec((k, k), lambda j: (0, 0)),   # W block index constant -> DMA'd once
        ],
        out_specs=tuple(a_out_specs),
        compiler_params=pltpu.CompilerParams(
            dimension_semantics=("parallel",),
            vmem_limit_bytes=vmem_limit_bytes,
        ),
    )(d, weight)
    d_prime = a_outs[0]                               # f32 D' (returned)
    d_score = a_outs[1] if score_dtype != jnp.float32 else d_prime

    # ---- Kernel B: scores = sigmoid(R @ D'.T). Grid (i, j) with j innermost so
    # each R block is fetched once per i and only the (bf16) D' tiles re-stream.
    scores = pl.pallas_call(
        functools.partial(_score_kernel, approx_sigmoid=use_bf16_matmul),
        out_shape=jax.ShapeDtypeStruct((size_u, size_v), out_dtype),
        grid=(pl.cdiv(size_u, tm), pl.cdiv(size_v, tn)),
        in_specs=[
            pl.BlockSpec((tm, k), lambda i, j: (i, 0)),
            pl.BlockSpec((tn, k), lambda i, j: (j, 0)),
        ],
        out_specs=pl.BlockSpec((tm, tn), lambda i, j: (i, j)),
        compiler_params=pltpu.CompilerParams(
            dimension_semantics=("parallel", "parallel"),
            vmem_limit_bytes=vmem_limit_bytes,
        ),
    )(r, d_score)

    return scores, r, d_prime


def xavier_uniform(key, shape, dtype=jnp.float32):
    fan_in, fan_out = shape[1], shape[0]
    limit = jnp.sqrt(6.0 / (fan_in + fan_out))
    return jax.random.uniform(key, shape, dtype, minval=-limit, maxval=limit)


if __name__ == "__main__":
    # --- Small case (toy usage of the module). ---
    size_u, size_v, input_dim = 16, 24, 32
    key = jax.random.PRNGKey(0)
    k_feat, k_w = jax.random.split(key)
    feature = jax.random.normal(k_feat, (size_u + size_v, input_dim), jnp.float32)
    weight = xavier_uniform(k_w, (input_dim, input_dim))   # nn.Linear.weight layout

    d_ref = jnp.dot(feature[size_u:], weight.T, precision=lax.Precision.HIGHEST)
    out_ref = jax.nn.sigmoid(
        jnp.dot(feature[:size_u], d_ref.T, precision=lax.Precision.HIGHEST))

    # Default path: bf16 MXU operands for the score matmul, f32 D'.
    outputs, R, D = inner_product_decoder(feature, weight, size_u, size_v)
    jax.block_until_ready((outputs, R, D))
    assert outputs.shape == (size_u, size_v)
    assert R.shape == (size_u, input_dim) and D.shape == (size_v, input_dim)
    assert jnp.allclose(D, d_ref, atol=5e-4)
    assert jnp.allclose(outputs, out_ref, atol=5e-2)

    # Full-f32 path (exact sigmoid): tight check.
    out32, _, d32 = inner_product_decoder(feature, weight, size_u, size_v,
                                          use_bf16_matmul=False)
    jax.block_until_ready(out32)
    assert jnp.allclose(out32, out_ref, atol=5e-4)
    assert jnp.allclose(d32, d_ref, atol=5e-4)

    # --- Ragged case: exercises cdiv grids and edge-block masking (no padding). ---
    su2, sv2, k2 = 300, 600, 200          # none of these align to 8 / 128 / tiles
    f2 = jax.random.normal(jax.random.PRNGKey(1), (su2 + sv2, k2), jnp.float32)
    w2 = xavier_uniform(jax.random.PRNGKey(2), (k2, k2))
    d2_ref = jnp.dot(f2[su2:], w2.T, precision=lax.Precision.HIGHEST)
    o2_ref = jax.nn.sigmoid(jnp.dot(f2[:su2], d2_ref.T, precision=lax.Precision.HIGHEST))

    o2, r2, d2 = inner_product_decoder(f2, w2, su2, sv2, use_bf16_matmul=False)
    jax.block_until_ready(o2)
    assert o2.shape == (su2, sv2) and d2.shape == (sv2, k2) and r2.shape == (su2, k2)
    assert jnp.allclose(d2, d2_ref, atol=5e-4)
    assert jnp.allclose(o2, o2_ref, atol=5e-4)

    o2b, _, _ = inner_product_decoder(f2, w2, su2, sv2)   # default bf16 path
    jax.block_until_ready(o2b)
    assert float(jnp.max(jnp.abs(o2b.astype(jnp.float32) - o2_ref))) < 0.15

    print("KERNEL_OK")
</pallas_src>

<mosaic_0001>
module attributes {stable_mosaic.version = 11 : i64} {
  func.func @_linear_kernel(%arg0: i32, %arg1: memref<24x32xf32, #tpu.memory_space<vmem>>, %arg2: memref<32x32xf32, #tpu.memory_space<vmem>>, %arg3: memref<24x32xf32, #tpu.memory_space<vmem>>, %arg4: memref<24x32xbf16, #tpu.memory_space<vmem>>) attributes {dimension_semantics = [#tpu.dimension_semantics<parallel>], iteration_bounds = array<i64: 1>, scalar_prefetch = 0 : i64, scratch_operands = 0 : i64, tpu.core_type = #tpu.core_type<tc>, window_params = [{transform_indices = @transform_0, window_bounds = array<i64: 24, 32>}, {pipeline_mode = #tpu.pipeline_mode<synchronous>, transform_indices = @transform_1, window_bounds = array<i64: 32, 32>}, {transform_indices = @transform_2, window_bounds = array<i64: 24, 32>}, {transform_indices = @transform_3, window_bounds = array<i64: 24, 32>}]} {
    %c0 = arith.constant 0 : index
    %c0_0 = arith.constant 0 : index
    %0 = vector.load %arg1[%c0, %c0_0] : memref<24x32xf32, #tpu.memory_space<vmem>>, vector<24x32xf32>
    %c0_1 = arith.constant 0 : index
    %c0_2 = arith.constant 0 : index
    %1 = vector.load %arg2[%c0_1, %c0_2] : memref<32x32xf32, #tpu.memory_space<vmem>>, vector<32x32xf32>
    %cst = arith.constant dense<0.000000e+00> : vector<24x32xf32>
    %2 = tpu.matmul %0, %1, %cst {dimension_numbers = #tpu.dot_dimension_numbers<[1], [1], [0], [0], [0, 0, 1, 0], [], []>} : vector<24x32xf32>, vector<32x32xf32>, vector<24x32xf32> -> vector<24x32xf32>
    %c0_3 = arith.constant 0 : index
    %c0_4 = arith.constant 0 : index
    %3 = vector.load %arg3[%c0_3, %c0_4] : memref<24x32xf32, #tpu.memory_space<vmem>>, vector<24x32xf32>
    tpu.vector_store %arg3[%c0_3, %c0_4], %2 {strides = array<i32>} : memref<24x32xf32, #tpu.memory_space<vmem>>, vector<24x32xf32>,
    %4 = arith.truncf %2 : vector<24x32xf32> to vector<24x32xbf16>
    %c0_5 = arith.constant 0 : index
    %c0_6 = arith.constant 0 : index
    %5 = vector.load %arg4[%c0_5, %c0_6] : memref<24x32xbf16, #tpu.memory_space<vmem>>, vector<24x32xbf16>
    tpu.vector_store %arg4[%c0_5, %c0_6], %4 {strides = array<i32>} : memref<24x32xbf16, #tpu.memory_space<vmem>>, vector<24x32xbf16>,
    return
  }
  func.func @transform_0(%arg0: i32) -> (i32, i32) {
    %c0_i32 = arith.constant 0 : i32
    %c0_i32_0 = arith.constant 0 : i32
    return %arg0, %c0_i32 : i32, i32
  }
  func.func @transform_1(%arg0: i32) -> (i32, i32) {
    %c0_i32 = arith.constant 0 : i32
    %c0_i32_0 = arith.constant 0 : i32
    %c0_i32_1 = arith.constant 0 : i32
    return %c0_i32, %c0_i32_0 : i32, i32
  }
  func.func @transform_2(%arg0: i32) -> (i32, i32) {
    %c0_i32 = arith.constant 0 : i32
    %c0_i32_0 = arith.constant 0 : i32
    return %arg0, %c0_i32 : i32, i32
  }
  func.func @transform_3(%arg0: i32) -> (i32, i32) {
    %c0_i32 = arith.constant 0 : i32
    %c0_i32_0 = arith.constant 0 : i32
    return %arg0, %c0_i32 : i32, i32
  }
}

</mosaic_0001>

<bundles_post_ra>
// kernel: tpu_custom_call.1
= control target key start
LH: loop header
LB: loop body
LE: loop exit
PB: predicated region body
PF: predicated region fallthrough
CT: control target
= control target key end

     0   :  { %9 = vsyncpa [#allocation3], 0  ;;  %s471_s0 = inlined_call_operand.hbm [shape: f32[24,32], index: 0, kind: input, shape index: {}]   ;;  %s472_s1 = inlined_call_operand.hbm [shape: f32[32,32], index: 1, kind: input, shape index: {}]   ;;  %s473_s2 = inlined_call_operand.hbm [shape: f32[24,32], index: 2, kind: output, shape index: {0}]   ;;  %s474_s3 = inlined_call_operand.hbm [shape: bf16[24,32], index: 3, kind: output, shape index: {1}]  }
   0x1   :  { %10 = vsyncpa [#allocation6], 0 }
   0x2   :  { %11 = vsyncpa [#allocation4], 0 }
   0x3   :  { %12 = vsyncpa [#allocation9], 0  ;;  %s362_s12 = smov [#allocation2]   ;;  %s266_s16 = scalar_lea.hbm %s471_s0, 384 }
   0x4   :  { %s18_s13 = sshll.u32 %s362_s12, 4  ;;  %p267_p0 = scmp.ne.s32.totalorder %s471_s0, %s266_s16  ;;  %s19_s13 = int_to_ptr.vmem [resolvable:$true] %s18_s13 }
   0x5   :  { %p270_p1 = scmp.lt.u32.totalorder %s266_s16, %s471_s0 }
   0x7   :  { %p272_p2 = pnand %p270_p1, %p267_p0 }
   0x9   :  { %275 = shalt.err (!%p272_p2)
}
   0xa   :  { %s276_s21 = scalar_lea.vmem %s19_s13, 384  ;;  %p281_p4 = scmp.lt.s32.totalorder %s19_s13, %s19_s13 }
   0xb   :  { %p277_p3 = scmp.ne.s32.totalorder %s19_s13, %s276_s21  ;;  %p282_p5 = scmp.lt.s32.totalorder %s276_s21, %s276_s21 }
   0xd   :  { %p283_p6 = por %p282_p5, %p281_p4 }
   0xf   :  { %p284_p7 = pnand %p283_p6, %p277_p3 }
  0x11   :  { %287 = shalt.err (!%p284_p7)
}
  0x12   :  { %s363_s22 = smov 128   ;;  %s364_s23 = smov 8  }
  0x13   :  { %24 = dma.hbm_to_vmem [thread:$0]  %s471_s0, 384, %s19_s13, [#allocation3], %s363_s22, %s363_s22, %s364_s23  }
  0x14   :  { %s365_s26 = smov [#allocation5]   ;;  %s288_s30 = scalar_lea.hbm %s472_s1, 512 }
  0x15   :  { %s30_s27 = sshll.u32 %s365_s26, 4  ;;  %p289_p8 = scmp.ne.s32.totalorder %s472_s1, %s288_s30  ;;  %s31_s27 = int_to_ptr.vmem [resolvable:$true] %s30_s27 }
  0x16   :  { %p292_p9 = scmp.lt.u32.totalorder %s288_s30, %s472_s1 }
  0x18   :  { %p294_p10 = pnand %p292_p9, %p289_p8 }
  0x1a   :  { %297 = shalt.err (!%p294_p10)
}
  0x1b   :  { %s298_s8 = scalar_lea.vmem %s31_s27, 512  ;;  %p303_p12 = scmp.lt.s32.totalorder %s31_s27, %s31_s27 }
  0x1c   :  { %p299_p11 = scmp.ne.s32.totalorder %s31_s27, %s298_s8  ;;  %p304_p13 = scmp.lt.s32.totalorder %s298_s8, %s298_s8 }
  0x1e   :  { %p305_p0 = por %p304_p13, %p303_p12 }
  0x20   :  { %p306_p1 = pnand %p305_p0, %p299_p11 }
  0x22   :  { %309 = shalt.err (!%p306_p1)
}
  0x23   :  { %36 = dma.hbm_to_vmem [thread:$0]  %s472_s1, 512, %s31_s27, [#allocation6], %s363_s22, %s363_s22, %s364_s23  }
  0x24   :  { %354 = dma.done.wait [#allocation3], 384  }
  0x25   :  { %355 = vsyncadd [#allocation3], 4294966912 }
  0x26   :  { %356 = dma.done.wait [#allocation6], 512  }
  0x27   :  { %357 = vsyncadd [#allocation6], 4294966784  ;;  %v366_v0 = vmov 0.0|0.0   ;;  %vm367_vm0 = vmmov 0   ;;  %v368_v1 = vmov 0.0   ;;  %vm50_vm1 = vcmask 261120  }
  0x28   :  { %251 = vmatprep.subr.bf16.mxu1 %v366_v0  ;;  %243 = vmatprep.subr.bf16.mxu0 %v366_v0  ;;  %v46_v2 = vld [vmem:[#allocation5] sm:$0xff]  ;;  %v47_v3 = vld [vmem:[#allocation5 + $0x8] sm:$0xff]  ;;  %vm245_vm2 = vmpackc.low %vm50_vm1, %vm50_vm1  ;;  %vm168_vm3 = vcmask 257024   ;;  %s369_s1 = smov [#allocation7]   ;;  %s370_s11 = smov [#allocation8]  }
  0x29   :  { %237 = vmatprep.mubr.msk.f32.mxu1 %vm367_vm0, %v368_v1  ;;  %234 = vmatprep.mubr.msk.f32.mxu0 %vm367_vm0, %v368_v1  ;;  %v244_v4 = vpack.c.bf16 %v47_v3, %v46_v2  ;;  %v48_v5 = vld [vmem:[#allocation5 + $0x10] sm:$0xff]  ;;  %v49_v6 = vld [vmem:[#allocation5 + $0x18] sm:$0xff]  ;;  %v43_v9 = vld [vmem:[#allocation2] sm:$0xff]  ;;  %s177_s10 = sshll.u32 %s369_s1, 4  ;;  %s189_s12 = sshll.u32 %s370_s11, 4  ;;  %s178_s10 = int_to_ptr.vmem [resolvable:$true] %s177_s10  ;;  %s435_s12 = int_to_ptr.vmem [resolvable:$true] %s189_s12 }
  0x2a   :  { %v248_v7 = vpack.c.bf16 %v49_v6, %v48_v5  ;;  %v44_v8 = vld [vmem:[#allocation2 + $0x8] sm:$0xff]  ;;  %v45_v10 = vld [vmem:[#allocation2 + $0x10] sm:$0xff]  ;;  %s310_s13 = scalar_lea.vmem %s178_s10, 384  ;;  %p315_p3 = scmp.lt.s32.totalorder %s178_s10, %s178_s10 }
  0x2b   :  { %253 = vmatpush3.bf16.xpose.msk.msra.mxu1 %vm245_vm2, %v244_v4  ;;  %246 = vmatpush3.bf16.xpose.msk.msra.mxu0 %vm245_vm2, %v244_v4  ;;  %p311_p2 = scmp.ne.s32.totalorder %s178_s10, %s310_s13  ;;  %p316_p4 = scmp.lt.s32.totalorder %s310_s13, %s310_s13 }
  0x2c   :  { %252 = vmatprep.subr.bf16.mxu1 %v366_v0  ;;  %247 = vmatprep.subr.bf16.mxu0 %v366_v0 }
  0x2d   :  { %p317_p5 = por %p316_p4, %p315_p3 }
  0x2f   :  { %p318_p6 = pnand %p317_p5, %p311_p2 }
  0x33   :  { %254 = vmatpush3.bf16.xpose.msk.msra.mxu1 %vm245_vm2, %v248_v7  ;;  %250 = vmatpush3.bf16.xpose.msk.msra.mxu0 %vm245_vm2, %v248_v7 }
  0x3a   :  { %238 = vmatmul.mubr.msk.f32.vlgmr.msra.gmra.mrb[0].mxu1 %vm50_vm1, %v44_v8  ;;  %235 = vmatmul.mubr.msk.f32.vlgmr.msra.gmra.mrb[0].mxu0 %vm50_vm1, %v43_v9 }
  0x3b   :  { %240 = vmatprep.mubr.msk.f32.mxu1 %vm367_vm0, %v368_v1 }
  0x3e   :  { %241 = vmatmul.mubr.msk.f32.gmra.mrb[2].mxu1 %vm50_vm1, %v45_v10 }
 0x10d   :  { %v143_v11 = vpop.f32.mrb[0].mxu1  ;;  %v138_v12 = vpop.f32.mrb[0].mxu0 }
 0x10e   :  { %153 = vst.msk [vmem:[#allocation7 + $0x8] sm:$0xff] %vm50_vm1, %v143_v11  ;;  %v217_v13 = vpack.c.bf16 %v143_v11, %v143_v11  ;;  %v239_v14 = vpop.f32.mrb[1].mxu1  ;;  %152 = vst.msk [vmem:[#allocation7] sm:$0xff] %vm50_vm1, %v138_v12  ;;  %v216_v15 = vpack.c.bf16 %v138_v12, %v138_v12  ;;  %v236_v16 = vpop.f32.mrb[1].mxu0 }
 0x110   :  { %170 = vst.msk [vmem:[#allocation8 + $0x4] sm:$0xf] %vm168_vm3, %v217_v13  ;;  %169 = vst.msk [vmem:[#allocation8] sm:$0xf] %vm168_vm3, %v216_v15 }
 0x111   :  { %v148_v17 = vpop.f32.mrb[2].mxu1 }
 0x112   :  { %154 = vst.msk [vmem:[#allocation7 + $0x10] sm:$0xff] %vm50_vm1, %v148_v17  ;;  %v218_v18 = vpack.c.bf16 %v148_v17, %v148_v17  ;;  %v242_v19 = vpop.f32.mrb[3].mxu1 }
 0x113   :  { %321 = shalt.err (!%p318_p6)
}
 0x114   :  { %s322_s16 = scalar_lea.hbm %s473_s2, 384 }
 0x115   :  { %p323_p7 = scmp.ne.s32.totalorder %s473_s2, %s322_s16  ;;  %p326_p8 = scmp.lt.u32.totalorder %s322_s16, %s473_s2 }
 0x117   :  { %p328_p9 = pnand %p326_p8, %p323_p7 }
 0x119   :  { %331 = shalt.err (!%p328_p9)
}
 0x11a   :  { %183 = dma.vmem_to_hbm [thread:$0]  %s178_s10, 384, %s473_s2, [#allocation4], %s363_s22, %s363_s22, %s364_s23   ;;  %171 = vst.msk [vmem:[#allocation8 + $0x8] sm:$0xf] %vm168_vm3, %v218_v18 }
 0x11b   :  { %s332_s25 = scalar_lea.vmem %s435_s12, 192  ;;  %p337_p11 = scmp.lt.s32.totalorder %s435_s12, %s435_s12 }
 0x11c   :  { %p333_p10 = scmp.ne.s32.totalorder %s435_s12, %s332_s25  ;;  %p338_p12 = scmp.lt.s32.totalorder %s332_s25, %s332_s25 }
 0x11e   :  { %p339_p13 = por %p338_p12, %p337_p11 }
 0x120   :  { %p340_p0 = pnand %p339_p13, %p333_p10 }
 0x122   :  { %343 = shalt.err (!%p340_p0)
}
 0x123   :  { %s344_s28 = scalar_lea.hbm %s474_s3, 192 }
 0x124   :  { %p345_p1 = scmp.ne.s32.totalorder %s474_s3, %s344_s28  ;;  %p348_p2 = scmp.lt.u32.totalorder %s344_s28, %s474_s3 }
 0x126   :  { %p350_p3 = pnand %p348_p2, %p345_p1 }
 0x128   :  { %353 = shalt.err (!%p350_p3)
}
 0x129   :  { %s371_s22 = smov 64   ;;  %s372_s23 = smov 4  }
 0x12a   :  { %195 = dma.vmem_to_hbm [thread:$0]  %s435_s12, 192, %s474_s3, [#allocation9], %s371_s22, %s371_s22, %s372_s23  }
 0x12b   :  { %358 = dma.done.wait [#allocation4], 384  }
 0x12c   :  { %359 = vsyncadd [#allocation4], 4294966912 }
 0x12d   :  { %360 = dma.done.wait [#allocation9], 192  }
 0x12e   :  { %361 = vsyncadd [#allocation9], 4294967104 }
 0x12f   :  { %202 = vsyncpa [#allocation3], 1 }
 0x130   :  { %203 = vsyncpa [#allocation6], 1 }
 0x131   :  { %204 = vsyncpa [#allocation4], 1 }
 0x132   :  { %205 = vsyncpa [#allocation9], 1 }

</bundles_post_ra>
